<compile_context>
chip_gen: v5e
topology: v5e:2x2
jax: 0.10.0
libtpu: 0.0.40
codegen_flags: <defaults>
</compile_context>

<pallas_src>
import jax
import jax.numpy as jnp
from jax.experimental import pallas as pl
from jax.experimental.pallas import tpu as pltpu


# ---------------------------------------------------------------------------
# Kernels
# ---------------------------------------------------------------------------

def _make_single_pass_kernel(s_valid, s_pad):
    """Fused pool + MLP + scale over whole (Nb, C, S_pad) blocks."""
    needs_mask = s_valid != s_pad
    inv_s = 1.0 / float(s_valid)

    def kernel(x_ref, w1t_ref, w2t_ref, o_ref):
        # x_ref: (Nb, C, S_pad) native dtype; w1t: (C, Ch); w2t: (Ch, C).
        x = x_ref[...]
        nb = x.shape[0]

        # Pooled stats in f32 (accumulate inside the reduction; no
        # materialized whole-block f32 copy of x).
        ssum = jnp.sum(x, axis=2, dtype=jnp.float32)              # (Nb, C)
        avg = ssum * inv_s                                        # mean over valid cols
        if needs_mask:
            col = jax.lax.broadcasted_iota(jnp.int32, x.shape, 2)
            xm = jnp.where(col < s_valid, x, float("-inf"))
        else:
            xm = x
        mx = jnp.max(xm, axis=2).astype(jnp.float32)              # (Nb, C)

        # Fused shared MLP on stacked [avg; max] rows (weights pre-transposed).
        p = jnp.concatenate([avg, mx], axis=0)                    # (2*Nb, C)
        h = jnp.dot(p, w1t_ref[...], preferred_element_type=jnp.float32)
        h = jnp.maximum(h, 0.0)                                   # ReLU
        y = jnp.dot(h, w2t_ref[...], preferred_element_type=jnp.float32)

        scale = jax.nn.sigmoid(y[:nb] + y[nb:]).astype(x.dtype)   # (Nb, C)
        # Final multiply in the input dtype (kernel is HBM-bound; keep VALU light).
        o_ref[...] = (x * scale[:, :, None]).astype(o_ref.dtype)

    return kernel


def _make_pool_kernel(s_valid, ts, needs_mask):
    """Two-pass path, pass 1: accumulate per-channel sum / max over S tiles."""

    def kernel(x_ref, sum_ref, max_ref):
        # x_ref: (1, tc, ts); sum_ref / max_ref: (1, tc, 1) f32 accumulators.
        si = pl.program_id(2)
        x = x_ref[...]
        psum = jnp.sum(x, axis=2, keepdims=True, dtype=jnp.float32)
        if needs_mask:
            col = si * ts + jax.lax.broadcasted_iota(jnp.int32, x.shape, 2)
            xm = jnp.where(col < s_valid, x, float("-inf"))
        else:
            xm = x
        pmax = jnp.max(xm, axis=2, keepdims=True).astype(jnp.float32)

        @pl.when(si == 0)
        def _():
            sum_ref[...] = psum
            max_ref[...] = pmax

        @pl.when(si != 0)
        def _():
            sum_ref[...] = sum_ref[...] + psum
            max_ref[...] = jnp.maximum(max_ref[...], pmax)

    return kernel


def _scale_kernel(x_ref, scale_ref, o_ref):
    """Two-pass path, pass 2: broadcast per-channel scale over spatial."""
    o_ref[...] = (x_ref[...] * scale_ref[...]).astype(o_ref.dtype)


# ---------------------------------------------------------------------------
# Block / budget selection
# ---------------------------------------------------------------------------

def _vmem_limits():
    """(vmem_limit_bytes, pipelined-buffer budget), generation aware."""
    try:
        cap = int(pltpu.get_tpu_info().vmem_capacity_bytes)
    except Exception:
        cap = 64 * 1024 * 1024          # conservative: v7x per-TensorCore VMEM
    vmem_limit = min(3 * cap // 4, 96 * 1024 * 1024)   # 48 MiB v7x, 96 MiB v5e/v6e
    pipe_budget = 3 * vmem_limit // 4                  # leave headroom for weights/scratch
    return vmem_limit, pipe_budget


def _pick_batch_block(n, in_bytes_per_batch, footprint_per_batch, budget_bytes,
                      target_in_bytes=1 << 20, min_grid=4):
    """Smallest batch block reaching ~1 MiB of input, preferring >= 4 grid steps."""
    divisors = [d for d in range(1, n + 1) if n % d == 0]
    fitting = [d for d in divisors if d * footprint_per_batch <= budget_bytes] or [1]
    cands = fitting
    for gmin in (min_grid, 2, 1):
        ok = [d for d in fitting if n // d >= gmin]
        if ok:
            cands = ok
            break
    big = [d for d in cands if d * in_bytes_per_batch >= target_in_bytes]
    return min(big) if big else max(cands)


def _pick_s_tile(s_pad, c, itemsize, budget_bytes, target_bytes=1 << 21):
    """Multiple-of-128 divisor of s_pad: smallest reaching ~2 MiB, within budget."""
    cands = [t for t in range(128, s_pad + 1, 128)
             if s_pad % t == 0 and 5 * c * t * itemsize <= budget_bytes]
    if not cands:
        return 128
    big = [t for t in cands if c * t * itemsize >= target_bytes]
    return min(big) if big else max(cands)


def _pick_c_tile(c, n_batch):
    """Full-C blocks unless N == 1, where splitting channels gives both
    TensorCores parallel work on the channel axis."""
    if n_batch >= 2 or c < 16 or c % 8 != 0:
        return c
    for tc in range(c // 2, 7, -1):
        if c % tc == 0 and tc % 8 == 0:
            return tc
    return c


# ---------------------------------------------------------------------------
# Wrapper
# ---------------------------------------------------------------------------

def channel_attention(x_nchw, w1, w2):
    """x_nchw: (N, C, H, W); w1: (C//ratio, C); w2: (C, C//ratio)."""
    N, C, H, W = x_nchw.shape
    S = H * W
    C_hid = w1.shape[0]
    itemsize = jnp.dtype(x_nchw.dtype).itemsize

    # Lane-dense last dim: pad flattened spatial to a multiple of 128.
    S_pad = ((S + 127) // 128) * 128
    x3 = x_nchw.reshape(N, C, S)
    if S_pad != S:
        x3 = jnp.pad(x3, ((0, 0), (0, 0), (0, S_pad - S)))

    # Pre-transpose weights once (grid-invariant) so the kernel does p @ w1t, h @ w2t.
    w1t = jnp.transpose(w1)          # (C, C_hid)
    w2t = jnp.transpose(w2)          # (C_hid, C)

    vmem_limit, pipe_budget = _vmem_limits()
    cparams = lambda sem: pltpu.CompilerParams(
        dimension_semantics=sem, vmem_limit_bytes=vmem_limit)

    in_bytes_per_batch = C * S_pad * itemsize
    # 2x-buffered input + 2x-buffered output + one block of compute headroom.
    footprint_per_batch = 5 * in_bytes_per_batch

    use_two_pass = (footprint_per_batch > pipe_budget) or (N == 1)

    if not use_two_pass:
        # ---- Single-pass path: grid over batch, whole (nb, C, S_pad) blocks.
        nb = _pick_batch_block(N, in_bytes_per_batch, footprint_per_batch, pipe_budget)
        out3 = pl.pallas_call(
            _make_single_pass_kernel(S, S_pad),
            out_shape=jax.ShapeDtypeStruct((N, C, S_pad), x_nchw.dtype),
            grid=(N // nb,),
            in_specs=[
                pl.BlockSpec((nb, C, S_pad), lambda n: (n, 0, 0)),
                pl.BlockSpec((C, C_hid), lambda n: (0, 0)),
                pl.BlockSpec((C_hid, C), lambda n: (0, 0)),
            ],
            out_specs=pl.BlockSpec((nb, C, S_pad), lambda n: (n, 0, 0)),
            compiler_params=cparams(("parallel",)),
        )(x3, w1t, w2t)
    else:
        # ---- Two-pass path (N == 1 or oversized blocks).
        ts = _pick_s_tile(S_pad, C, itemsize, pipe_budget)
        tc = _pick_c_tile(C, N)
        n_s, n_c = S_pad // ts, C // tc

        # Pass 1: per-channel sum / max accumulated over S tiles.
        sum_nc1, max_nc1 = pl.pallas_call(
            _make_pool_kernel(S, ts, S != S_pad),
            out_shape=(jax.ShapeDtypeStruct((N, C, 1), jnp.float32),
                       jax.ShapeDtypeStruct((N, C, 1), jnp.float32)),
            grid=(N, n_c, n_s),
            in_specs=[pl.BlockSpec((1, tc, ts), lambda n, c, s: (n, c, s))],
            out_specs=(pl.BlockSpec((1, tc, 1), lambda n, c, s: (n, c, 0)),
                       pl.BlockSpec((1, tc, 1), lambda n, c, s: (n, c, 0))),
            compiler_params=cparams(("parallel", "parallel", "arbitrary")),
        )(x3)

        # Tiny MLP + sigmoid on (N, C) stats in plain XLA (off the critical path).
        avg = sum_nc1[:, :, 0] * (1.0 / float(S))
        mx = max_nc1[:, :, 0]
        p = jnp.concatenate([avg, mx], axis=0)
        h = jnp.maximum(p @ w1t.astype(jnp.float32), 0.0)
        y = h @ w2t.astype(jnp.float32)
        scale = jax.nn.sigmoid(y[:N] + y[N:]).astype(x_nchw.dtype)[:, :, None]  # (N,C,1)

        # Pass 2: apply the per-channel scale over freely tiled blocks.
        out3 = pl.pallas_call(
            _scale_kernel,
            out_shape=jax.ShapeDtypeStruct((N, C, S_pad), x_nchw.dtype),
            grid=(N, n_c, n_s),
            in_specs=[pl.BlockSpec((1, tc, ts), lambda n, c, s: (n, c, s)),
                      pl.BlockSpec((1, tc, 1), lambda n, c, s: (n, c, 0))],
            out_specs=pl.BlockSpec((1, tc, ts), lambda n, c, s: (n, c, s)),
            compiler_params=cparams(("parallel", "parallel", "parallel")),
        )(x3, scale)

    if S_pad != S:
        out3 = out3[:, :, :S]
    return out3.reshape(N, C, H, W)


def channel_attention_ref(x, w1, w2):
    # Pure-JAX reference of the PyTorch forward (sanity check).
    avg = jnp.mean(x, axis=(2, 3), keepdims=True)      # (N, C, 1, 1)
    mx = jnp.max(x, axis=(2, 3), keepdims=True)

    def mlp(p):  # p: (N, C, 1, 1)
        h = jnp.einsum("oc,nchw->nohw", w1, p)
        h = jnp.maximum(h, 0.0)
        return jnp.einsum("co,nohw->nchw", w2, h)

    out = mlp(avg) + mlp(mx)
    return jax.nn.sigmoid(out) * x


if __name__ == "__main__":
    key = jax.random.PRNGKey(0)
    kx, k1, k2 = jax.random.split(key, 3)

    ratio = 16
    N, C, H, W = 2, 64, 16, 16
    C_hid = C // ratio

    x = jax.random.normal(kx, (N, C, H, W), dtype=jnp.float32)
    # 1x1 conv weights (out, in, 1, 1) -> (out, in) matrices, deterministic init.
    w1 = jax.random.normal(k1, (C_hid, C), dtype=jnp.float32) * 0.1
    w2 = jax.random.normal(k2, (C, C_hid), dtype=jnp.float32) * 0.1

    # 1) Batched single-pass path (grid over batch, lane-dense S).
    y = jax.block_until_ready(channel_attention(x, w1, w2))
    assert y.shape == (N, C, H, W)
    assert jnp.allclose(y, channel_attention_ref(x, w1, w2), atol=1e-5, rtol=1e-5)

    # 2) N == 1 -> two-pass (pool / apply) path with channel-tiled parallel grid.
    x1 = x[:1]
    y1 = jax.block_until_ready(channel_attention(x1, w1, w2))
    assert jnp.allclose(y1, channel_attention_ref(x1, w1, w2), atol=1e-5, rtol=1e-5)

    # 3) Non-128-multiple spatial size -> lane padding + masked max (single pass).
    xp = jax.random.normal(kx, (N, C, 10, 10), dtype=jnp.float32)
    yp = jax.block_until_ready(channel_attention(xp, w1, w2))
    assert jnp.allclose(yp, channel_attention_ref(xp, w1, w2), atol=1e-5, rtol=1e-5)

    # 4) N == 1 with padded spatial -> two-pass path with masked max.
    xq = xp[:1]
    yq = jax.block_until_ready(channel_attention(xq, w1, w2))
    assert jnp.allclose(yq, channel_attention_ref(xq, w1, w2), atol=1e-5, rtol=1e-5)

    print("KERNEL_OK")
</pallas_src>

<mosaic_0001>
module attributes {stable_mosaic.version = 11 : i64} {
  func.func @kernel(%arg0: i32, %arg1: memref<1x64x256xf32, #tpu.memory_space<vmem>>, %arg2: memref<64x4xf32, #tpu.memory_space<vmem>>, %arg3: memref<4x64xf32, #tpu.memory_space<vmem>>, %arg4: memref<1x64x256xf32, #tpu.memory_space<vmem>>) attributes {dimension_semantics = [#tpu.dimension_semantics<parallel>], iteration_bounds = array<i64: 2>, scalar_prefetch = 0 : i64, scratch_operands = 0 : i64, tpu.core_type = #tpu.core_type<tc>, window_params = [{transform_indices = @transform_0, window_bounds = array<i64: 1, 64, 256>}, {pipeline_mode = #tpu.pipeline_mode<synchronous>, transform_indices = @transform_1, window_bounds = array<i64: 64, 4>}, {pipeline_mode = #tpu.pipeline_mode<synchronous>, transform_indices = @transform_2, window_bounds = array<i64: 4, 64>}, {transform_indices = @transform_3, window_bounds = array<i64: 1, 64, 256>}]} {
    %c0 = arith.constant 0 : index
    %c0_0 = arith.constant 0 : index
    %c0_1 = arith.constant 0 : index
    %0 = vector.load %arg1[%c0, %c0_0, %c0_1] : memref<1x64x256xf32, #tpu.memory_space<vmem>>, vector<1x64x256xf32>
    %cst = arith.constant dense<0.000000e+00> : vector<1x64xf32>
    %1 = vector.multi_reduction <add>, %0, %cst [2] : vector<1x64x256xf32> to vector<1x64xf32>
    %cst_2 = arith.constant 3.906250e-03 : f32
    %2 = vector.broadcast %cst_2 : f32 to vector<1x64xf32>
    %3 = arith.mulf %1, %2 : vector<1x64xf32>
    %cst_3 = arith.constant dense<0xFF800000> : vector<1x64xf32>
    %4 = vector.multi_reduction <maximumf>, %0, %cst_3 [2] : vector<1x64x256xf32> to vector<1x64xf32>
    %5 = tpu.concatenate %3, %4 in 0 : vector<1x64xf32>, vector<1x64xf32> -> vector<2x64xf32>
    %c0_4 = arith.constant 0 : index
    %c0_5 = arith.constant 0 : index
    %6 = vector.load %arg2[%c0_4, %c0_5] : memref<64x4xf32, #tpu.memory_space<vmem>>, vector<64x4xf32>
    %cst_6 = arith.constant dense<0.000000e+00> : vector<2x4xf32>
    %7 = tpu.matmul %5, %6, %cst_6 {dimension_numbers = #tpu.dot_dimension_numbers<[1], [0], [0], [1], [0, 0, 1, 1], [], []>} : vector<2x64xf32>, vector<64x4xf32>, vector<2x4xf32> -> vector<2x4xf32>
    %cst_7 = arith.constant 0.000000e+00 : f32
    %8 = vector.broadcast %cst_7 : f32 to vector<2x4xf32>
    %9 = arith.maximumf %7, %8 : vector<2x4xf32>
    %c0_8 = arith.constant 0 : index
    %c0_9 = arith.constant 0 : index
    %10 = vector.load %arg3[%c0_8, %c0_9] : memref<4x64xf32, #tpu.memory_space<vmem>>, vector<4x64xf32>
    %cst_10 = arith.constant dense<0.000000e+00> : vector<2x64xf32>
    %11 = tpu.matmul %9, %10, %cst_10 {dimension_numbers = #tpu.dot_dimension_numbers<[1], [0], [0], [1], [0, 0, 1, 1], [], []>} : vector<2x4xf32>, vector<4x64xf32>, vector<2x64xf32> -> vector<2x64xf32>
    %12 = vector.extract_strided_slice %11 {offsets = [0, 0], sizes = [1, 64], strides = [1, 1]} : vector<2x64xf32> to vector<1x64xf32>
    %13 = vector.extract_strided_slice %11 {offsets = [1, 0], sizes = [1, 64], strides = [1, 1]} : vector<2x64xf32> to vector<1x64xf32>
    %14 = arith.addf %12, %13 : vector<1x64xf32>
    %15 = arith.negf %14 : vector<1x64xf32>
    %16 = math.exp %15 : vector<1x64xf32>
    %cst_11 = arith.constant 1.000000e+00 : f32
    %17 = vector.broadcast %cst_11 : f32 to vector<1x64xf32>
    %18 = arith.addf %17, %16 : vector<1x64xf32>
    %19 = arith.divf %17, %18 : vector<1x64xf32>
    %20 = vector.shape_cast %19 : vector<1x64xf32> to vector<1x64x1xf32>
    %21 = vector.broadcast %20 : vector<1x64x1xf32> to vector<1x64x256xf32>
    %22 = arith.mulf %0, %21 : vector<1x64x256xf32>
    %c0_12 = arith.constant 0 : index
    %c0_13 = arith.constant 0 : index
    %c0_14 = arith.constant 0 : index
    %23 = vector.load %arg4[%c0_12, %c0_13, %c0_14] : memref<1x64x256xf32, #tpu.memory_space<vmem>>, vector<1x64x256xf32>
    tpu.vector_store %arg4[%c0_12, %c0_13, %c0_14], %22 {strides = array<i32>} : memref<1x64x256xf32, #tpu.memory_space<vmem>>, vector<1x64x256xf32>,
    return
  }
  func.func @transform_0(%arg0: i32) -> (i32, i32, i32) {
    %c0_i32 = arith.constant 0 : i32
    %c0_i32_0 = arith.constant 0 : i32
    %c0_i32_1 = arith.constant 0 : i32
    return %arg0, %c0_i32, %c0_i32_0 : i32, i32, i32
  }
  func.func @transform_1(%arg0: i32) -> (i32, i32) {
    %c0_i32 = arith.constant 0 : i32
    %c0_i32_0 = arith.constant 0 : i32
    %c0_i32_1 = arith.constant 0 : i32
    return %c0_i32, %c0_i32_0 : i32, i32
  }
  func.func @transform_2(%arg0: i32) -> (i32, i32) {
    %c0_i32 = arith.constant 0 : i32
    %c0_i32_0 = arith.constant 0 : i32
    %c0_i32_1 = arith.constant 0 : i32
    return %c0_i32, %c0_i32_0 : i32, i32
  }
  func.func @transform_3(%arg0: i32) -> (i32, i32, i32) {
    %c0_i32 = arith.constant 0 : i32
    %c0_i32_0 = arith.constant 0 : i32
    %c0_i32_1 = arith.constant 0 : i32
    return %arg0, %c0_i32, %c0_i32_0 : i32, i32, i32
  }
}

</mosaic_0001>

<bundles_post_ra>
// kernel: tpu_custom_call.1
= control target key start
LH: loop header
LB: loop body
LE: loop exit
PB: predicated region body
PF: predicated region fallthrough
CT: control target
= control target key end

     0   :  { %8 = vsyncpa [#allocation3], 0  ;;  %s1074_s0 = inlined_call_operand.hbm [shape: f32[2,64,256], index: 0, kind: input, shape index: {}]   ;;  %s1075_s1 = inlined_call_operand.vmem [shape: f32[64,4], index: 1, kind: input, shape index: {}]   ;;  %s1076_s2 = inlined_call_operand.vmem [shape: f32[4,64], index: 2, kind: input, shape index: {}]   ;;  %s1077_s3 = inlined_call_operand.hbm [shape: f32[2,64,256], index: 3, kind: output, shape index: {}]  }
   0x1   :  { %10 = vsyncpa [#allocation3 + $0x1], 0 }
   0x2   :  { %11 = vsyncpa [#allocation4], 0 }
   0x3   :  { %13 = vsyncpa [#allocation4 + $0x1], 0  ;;  %s789_s12 = smov 0   ;;  %s791_s13 = smov 0  }
   0x4   :  { %s793_s14 = smov 0   ;;  %s795_s15 = smov 0  }
   0x5 LB: > { %s810_s16 = sadd.s32 4294967295, %s763_s15   ;;  %s584_s17 = sadd.s32 4294967294, %s763_s15   ;;  %s763_s15 = sphi %s795_s15, %s1087_s15   ;;  %s759_s14 = sphi %s793_s14, %s1086_s14   ;;  %s755_s13 = sphi %s791_s13, %s1085_s13   ;;  %s751_s12 = sphi %s789_s12, %s1084_s12  }
   0x6   : > { %s814_s18 = sadd.s32 1, %s763_s15   ;;  %s26_s19 = sadd.s32 1, %s759_s14 }
   0x7   : > { %s23_s20 = ssub.s32 %s763_s15, %s814_s18  ;;  %p33_p0 = scmp.ne.s32.totalorder %s759_s14, %s755_s13 }
   0x8   : > { %p24_p1 = scmp.eq.s32.totalorder %s23_s20, 0  ;;  %p34_p2 = scmp.eq.s32.totalorder %s763_s15, 0 }
   0x9   : > { %p39_p3 = scmp.ne.s32.totalorder %s755_s13, %s751_s12  ;;  %p40_p4 = scmp.eq.s32.totalorder %s810_s16, 0 }
   0xa   : > { %s826_s21 = scalar_select %p24_p1, %s759_s14, %s26_s19  }
   0xb   : > { %p828_p5 = por %p34_p2, %p33_p0  ;;  %p832_p6 = por %p40_p4, %p39_p3 }
   0xc   : > { %p105_p7 = scmp.eq.s32.totalorder %s810_s16, 1  ;;  %p111_p8 = scmp.eq.s32.totalorder %s584_s17, 1 }
   0xd   : > { %p616_p10 = scmp.lt.s32.totalorder %s763_s15, 2  ;;  %s137_s26 = sand.u32 1, %s759_s14  }
   0xe   : > { %p839_p11 = por %p105_p7, %p33_p0  ;;  %p843_p12 = por %p111_p8, %p39_p3 }
   0xf   : > { %s602_s27 = sshll.u32 %s763_s15, 7  ;;  %s587_s28 = sshll.u32 %s137_s26, 7 }
  0x10   : > { %s146_s4 = scalar_lea.hbm %s1074_s0, %s602_s27  ;;  %s141_s6 = scalar_lea.vmem [#allocation2], %s587_s28 }
  0x11   : > { %s147_s5 = sshll.u32 %s146_s4, 4  ;;  %s149_s7 = sshll.u32 %s141_s6, 4  ;;  %s148_s5 = int_to_ptr.hbm [resolvable:$true] %s147_s5  ;;  %s150_s7 = int_to_ptr.vmem [resolvable:$true] %s149_s7 }
  0x12   : > { %p854_p13 = pnand %p616_p10, %p828_p5  ;;  %p590_p0 = scmp.ge.s32.totalorder %s763_s15, 1 }
  0x13   : > { %p157_p1 = scmp.lt.s32.totalorder %s763_s15, 3  ;;  %s138_s9 = scalar_lea.sflag [#allocation3], %s137_s26 }
  0x14   : > { %s667_s10 = sshra.s32 %s148_s5, 4  ;;  %p671_p3 = pneg %p854_p13  ;;  %s668_s10 = int_to_ptr.hbm [resolvable:$true] %s667_s10 }
  0x15   : > { %s669_s11 = scalar_lea.hbm %s668_s10, 128  ;;  %s674_s20 = scalar_lea.hbm %s1074_s0, 256 }
  0x16   : > { %p670_p2 = scmp.ne.s32.totalorder %s668_s10, %s669_s11  ;;  %p675_p5 = scmp.lt.s32.totalorder %s668_s10, %s1074_s0 }
  0x17   : > { %p676_p8 = scmp.lt.s32.totalorder %s674_s20, %s669_s11 }
  0x18   : > { %p672_p4 = pnand %p671_p3, %p670_p2 }
  0x19   : > { %p677_p10 = por %p676_p8, %p675_p5 }
  0x1a   : > { %p673_p7 = pneg %p672_p4 }
  0x1c   : > { %p678_p9 = pnand %p677_p10, %p673_p7 }
  0x1e   : > { %681 = shalt.err (!%p678_p9)
}
  0x1f   : > { %s765_s26 = smov 256   ;;  %s766_s28 = smov 16  }
  0x20   : > { %611 = dma.hbm_to_vmem [thread:$0]  (!%p854_p13), %s148_s5, 2048, %s150_s7, %s138_s9, %s765_s26, %s765_s26, %s766_s28  }
  0x21   : > { %p158_p2 = pnand %p590_p0, %p157_p1 }
  0x22   : > { %s875_s29 = sand.u32 (!%p158_p2), 1, %s755_s13  }
  0x23   : > { %161 = sbr.rel (%p158_p2) target bundleno = 648 (0x288), region = 32  ;;  %s591_s30 = sshll.u32 (!%p158_p2), %s875_s29, 7 }
  0x24   : > { %s164_s4 = scalar_lea.sflag (!%p158_p2), [#allocation3], %s875_s29  ;;  %s881_s6 = scalar_lea.vmem (!%p158_p2), [#allocation2], %s591_s30 }
  0x28   : > { %742 = dma.done.wait (%p832_p6), %s164_s4, 2048  }
  0x29   : > { %744 = vsyncadd (%p832_p6), %s164_s4, 4294965248  ;;  %v888_v0 = vld [vmem:[%s881_s6 + $0x20] sm:$0xff]  ;;  %v891_v1 = vld [vmem:[%s881_s6 + $0x28] sm:$0xff]  ;;  %v271_v49 = vlaneseq  ;;  %vm276_vm0 = vcmask 130112   ;;  %vm280_vm1 = vcmask 195712   ;;  %vm284_vm2 = vcmask 261312  }
  0x2a   : > { %v894_v2 = vld [vmem:[%s881_s6] sm:$0xff]  ;;  %v213_v3 = vadd.f32 %v891_v1, %v888_v0  ;;  %v899_v4 = vld [vmem:[%s881_s6 + $0x8] sm:$0xff]  ;;  %v906_v7 = vld [vmem:[%s881_s6 + $0x30] sm:$0xff]  ;;  %v245_v18 = vmax.f32 %v888_v0, %v891_v1  ;;  %vm288_vm3 = vcmask 326912   ;;  %vm292_vm4 = vcmask 392512   ;;  %s1008_s7 = scalar_lea.vmem [#allocation5], %s591_s30 }
  0x2b   : > { %v239_v5 = vmax.f32 %v894_v2, %v899_v4  ;;  %v207_v6 = vadd.f32 %v899_v4, %v894_v2  ;;  %v909_v8 = vld [vmem:[%s881_s6 + $0x38] sm:$0xff]  ;;  %v912_v9 = vld [vmem:[%s881_s6 + $0x10] sm:$0xff]  ;;  %v924_v14 = vld [vmem:[%s881_s6 + $0x40] sm:$0xff]  ;;  %v272_v50 = vand.u32 127, %v271_v49  ;;  %vm296_vm5 = vcmask 458112   ;;  %s603_s30 = sshll.u32 %s810_s16, 7 }
  0x2c   : > { %214 = vadd.xlane.f32.xlu1 %v213_v3  ;;  %v915_v10 = vld [vmem:[%s881_s6 + $0x18] sm:$0xff]  ;;  %v216_v11 = vadd.f32 %v909_v8, %v906_v7  ;;  %v927_v15 = vld [vmem:[%s881_s6 + $0x48] sm:$0xff]  ;;  %v930_v16 = vld [vmem:[%s881_s6 + $0x50] sm:$0xff]  ;;  %v248_v24 = vmax.f32 %v906_v7, %v909_v8  ;;  %vm300_vm6 = vcmask 523712   ;;  %vm327_vm7 = vcmask 1040384   ;;  %s507_s10 = scalar_lea.hbm %s1077_s3, %s603_s30  ;;  %s508_s11 = sshll.u32 %s1008_s7, 4  ;;  %s509_s11 = int_to_ptr.vmem [resolvable:$true] %s508_s11 }
  0x2d   : > { %240 = vmax.xlane.f32.xlu2 %v239_v5  ;;  %208 = vadd.xlane.f32.xlu0 %v207_v6  ;;  %v242_v12 = vmax.f32 %v912_v9, %v915_v10  ;;  %v210_v13 = vadd.f32 %v915_v10, %v912_v9  ;;  %v933_v17 = vld [vmem:[%s881_s6 + $0x58] sm:$0xff]  ;;  %v219_v19 = vadd.f32 %v927_v15, %v924_v14  ;;  %v942_v21 = vld [vmem:[%s881_s6 + $0x60] sm:$0xff]  ;;  %v945_v22 = vld [vmem:[%s881_s6 + $0x68] sm:$0xff]  ;;  %v274_v54 = vadd.s32 4294967288, %v272_v50  ;;  %s510_s17 = sshll.u32 %s507_s10, 4  ;;  %s496_s19 = scalar_lea.sflag [#allocation4], %s875_s29  ;;  %s511_s17 = int_to_ptr.hbm [resolvable:$true] %s510_s17 }
  0x2e   : > { %v222_v20 = vadd.f32 %v933_v17, %v930_v16  ;;  %v225_v23 = vadd.f32 %v945_v22, %v942_v21  ;;  %v251_v25 = vmax.f32 %v924_v14, %v927_v15  ;;  %v954_v26 = vld [vmem:[%s881_s6 + $0x70] sm:$0xff]  ;;  %v957_v27 = vld [vmem:[%s881_s6 + $0x78] sm:$0xff]  ;;  %v254_v28 = vmax.f32 %v930_v16, %v933_v17  ;;  %v334_v37 = vld [vmem:[%s1075_s1 + $0x28] sm:$0xff]  ;;  %s711_s16 = sshra.s32 %s511_s17, 4  ;;  %s717_s26 = scalar_lea.hbm %s1077_s3, 256  ;;  %s712_s16 = int_to_ptr.hbm [resolvable:$true] %s711_s16 }
  0x2f   : > { %v228_v29 = vadd.f32 %v957_v27, %v954_v26  ;;  %v257_v30 = vmax.f32 %v942_v21, %v945_v22  ;;  %v260_v31 = vmax.f32 %v954_v26, %v957_v27  ;;  %v336_v32 = vld [vmem:[%s1075_s1 + $0x38] sm:$0xff]  ;;  %v335_v33 = vld [vmem:[%s1075_s1 + $0x30] sm:$0xff]  ;;  %v333_v38 = vld [vmem:[%s1075_s1 + $0x20] sm:$0xff]  ;;  %v278_v58 = vadd.s32 4294967280, %v272_v50  ;;  %s713_s20 = scalar_lea.hbm %s712_s16, 128  ;;  %p718_p0 = scmp.lt.s32.totalorder %s712_s16, %s1077_s3 }
  0x30   : > { %349 = vmatpush.msra.mxu0 %v336_v32  ;;  %v332_v39 = vld [vmem:[%s1075_s1 + $0x18] sm:$0xff]  ;;  %v331_v40 = vld [vmem:[%s1075_s1 + $0x10] sm:$0xff]  ;;  %v330_v44 = vld [vmem:[%s1075_s1 + $0x8] sm:$0xff]  ;;  %v282_v61 = vadd.s32 4294967272, %v272_v50  ;;  %vm337_vm8 = vcmask 523264   ;;  %vm367_vm9 = vcmask 1043456   ;;  %p714_p6 = scmp.ne.s32.totalorder %s712_s16, %s713_s20  ;;  %p719_p1 = scmp.lt.s32.totalorder %s717_s26, %s713_s20 }
  0x31   : > { %v329_v45 = vld [vmem:[%s1075_s1] sm:$0xff]  ;;  %vm363_vm10 = vcmask 31744  }
  0x32   : > { %350 = vmatpush.msra.mxu0 %v335_v33  ;;  %p715_p9 = pnand %p714_p6, %p839_p11  ;;  %p720_p3 = por %p719_p1, %p718_p0 }
  0x34   : > { %217 = vadd.xlane.f32.xlu1 %v216_v11  ;;  %351 = vmatpush.msra.mxu0 %v334_v37  ;;  %v286_v11 = vadd.s32 4294967264, %v272_v50  ;;  %v298_v37 = vadd.s32 4294967240, %v272_v50  ;;  %p716_p13 = pneg %p715_p9 }
  0x35   : > { %243 = vmax.xlane.f32.xlu2 %v242_v12  ;;  %211 = vadd.xlane.f32.xlu0 %v210_v13 }
  0x36   : > { %352 = vmatpush.msra.mxu0 %v333_v38  ;;  %p721_p4 = pnand %p720_p3, %p716_p13 }
  0x38   : > { %353 = vmatpush.msra.mxu0 %v332_v39 }
  0x3a   : > { %354 = vmatpush.msra.mxu0 %v331_v40 }
  0x3c   : > { %246 = vmax.xlane.f32.xlu1 %v245_v18  ;;  %355 = vmatpush.msra.mxu0 %v330_v44 }
  0x3d   : > { %220 = vadd.xlane.f32.xlu0 %v219_v19  ;;  %223 = vadd.xlane.f32.xlu2 %v222_v20  ;;  %v290_v19 = vadd.s32 4294967256, %v272_v50  ;;  %v294_v20 = vadd.s32 4294967248, %v272_v50 }
  0x3e   : > { %356 = vmatpush.msra.mxu0 %v329_v45 }
  0x44   : > { %226 = vadd.xlane.f32.xlu1 %v225_v23 }
  0x45   : > { %249 = vmax.xlane.f32.xlu0 %v248_v24  ;;  %252 = vmax.xlane.f32.xlu2 %v251_v25 }
  0x4c   : > { %255 = vmax.xlane.f32.xlu1 %v254_v28 }
  0x4d   : > { %229 = vadd.xlane.f32.xlu0 %v228_v29  ;;  %258 = vmax.xlane.f32.xlu2 %v257_v30 }
  0x55   : > { %261 = vmax.xlane.f32.xlu0 %v260_v31 }
  0x9f   : > { %v215_v34 = vpop.xlane.xlu1 %214 }
  0xa0   : > { %v241_v35 = vpop.xlane.xlu2 %240  ;;  %v209_v36 = vpop.xlane.xlu0 %208  ;;  %v233_v59 = vmul.f32 0.00390625, %v215_v34 }
  0xa1   : > { %v231_v53 = vmul.f32 0.00390625, %v209_v36  ;;  %v311_v62 = vperm.slane %v241_v35, %v272_v50 }
  0xa2   : > { %v279_v13 = vperm.slane %v233_v59, %v278_v58 }
  0xa3   : > { %v273_v60 = vperm.slane %v231_v53, %v272_v50 }
  0xa7   : > { %v218_v41 = vpop.xlane.xlu1 %217 }
  0xa8   : > { %v244_v42 = vpop.xlane.xlu2 %243  ;;  %v212_v43 = vpop.xlane.xlu0 %211  ;;  %v234_v63 = vmul.f32 0.00390625, %v218_v41 }
  0xa9   : > { %v232_v51 = vmul.f32 0.00390625, %v212_v43  ;;  %v312_v3 = vperm.slane %v244_v42, %v274_v54 }
  0xaa   : > { %v283_v25 = vperm.slane %v234_v63, %v282_v61 }
  0xab   : > { %v275_v57 = vperm.slane %v232_v51, %v274_v54  ;;  %v313_v28 = vsel %vm276_vm0, %v312_v3, %v311_v62 }
  0xad   : > { %v277_v5 = vsel %vm276_vm0, %v275_v57, %v273_v60  ;;  %v362_v57 = vld [vmem:[%s1076_s2] sm:$0xf]  ;;  %v416_v60 = vshrl.u32 %v271_v49, 7 }
  0xae   : > { %v281_v29 = vsel %vm280_vm1, %v279_v13, %v277_v5  ;;  %594 = vmatpush.msk.msra.mxu1 %vm367_vm9, %v362_v57 }
  0xaf   : > { %v247_v46 = vpop.xlane.xlu1 %246  ;;  %v285_v40 = vsel %vm284_vm2, %v283_v25, %v281_v29  ;;  %654 = vset.pattern.permute.xlu1 %v416_v60  ;;  %v423_v62 = vadd.s32 8, %v416_v60 }
  0xb0   : > { %v221_v47 = vpop.xlane.xlu0 %220  ;;  %v224_v48 = vpop.xlane.xlu2 %223  ;;  %v314_v6 = vperm.slane %v247_v46, %v278_v58 }
  0xb1   : > { %v235_v12 = vmul.f32 0.00390625, %v221_v47  ;;  %v236_v30 = vmul.f32 0.00390625, %v224_v48  ;;  %655 = vset.pattern.permute.xlu2 %v423_v62 }
  0xb2   : > { %v315_v31 = vsel %vm280_vm1, %v314_v6, %v313_v28 }
  0xb3   : > { %v287_v32 = vperm.slane %v235_v12, %v286_v11  ;;  %v291_v41 = vperm.slane %v236_v30, %v290_v19 }
  0xb5   : > { %v289_v42 = vsel %vm288_vm3, %v287_v32, %v285_v40  ;;  %v441_v32 = vadd.s32 32, %v416_v60 }
  0xb6   : > { %v293_v51 = vsel %vm292_vm4, %v291_v41, %v289_v42 }
  0xb7   : > { %v227_v52 = vpop.xlane.xlu1 %226 }
  0xb8   : > { %v250_v55 = vpop.xlane.xlu0 %249  ;;  %v253_v56 = vpop.xlane.xlu2 %252  ;;  %v237_v33 = vmul.f32 0.00390625, %v227_v52 }
  0xb9   : > { %v316_v18 = vperm.slane %v250_v55, %v282_v61  ;;  %v318_v34 = vperm.slane %v253_v56, %v286_v11  ;;  %v429_v61 = vadd.s32 16, %v416_v60 }
  0xba   : > { %v295_v43 = vperm.slane %v237_v33, %v294_v20  ;;  %v459_v33 = vadd.s32 56, %v416_v60 }
  0xbb   : > { %v317_v35 = vsel %vm284_vm2, %v316_v18, %v315_v31  ;;  %656 = vset.pattern.permute.xlu0 %v429_v61  ;;  %v435_v31 = vadd.s32 24, %v416_v60 }
  0xbc   : > { %v319_v44 = vsel %vm288_vm3, %v318_v34, %v317_v35  ;;  %v297_v53 = vsel %vm296_vm5, %v295_v43, %v293_v51  ;;  %v447_v34 = vadd.s32 40, %v416_v60  ;;  %v453_v35 = vadd.s32 48, %v416_v60 }
  0xbf   : > { %v256_v23 = vpop.xlane.xlu1 %255 }
  0xc0   : > { %v230_v24 = vpop.xlane.xlu0 %229  ;;  %v320_v36 = vperm.slane %v256_v23, %v290_v19  ;;  %v259_v39 = vpop.xlane.xlu2 %258 }
  0xc1   : > { %v238_v38 = vmul.f32 0.00390625, %v230_v24  ;;  %v322_v45 = vperm.slane %v259_v39, %v294_v20 }
  0xc2   : > { %v321_v46 = vsel %vm292_vm4, %v320_v36, %v319_v44 }
  0xc3   : > { %v299_v47 = vperm.slane %v238_v38, %v298_v37  ;;  %v323_v50 = vsel %vm296_vm5, %v322_v45, %v321_v46 }
  0xc5   : > { %v301_v54 = vsel %vm300_vm6, %v299_v47, %v297_v53 }
  0xc8   : > { %v262_v48 = vpop.xlane.xlu0 %261 }
  0xc9   : > { %v324_v52 = vperm.slane %v262_v48, %v298_v37 }
  0xcb   : > { %v325_v55 = vsel %vm300_vm6, %v324_v52, %v323_v50 }
  0xcc   : > { %v328_v56 = vsel %vm327_vm7, %v301_v54, %v325_v55 }
  0xcd   : > { %593 = vmatmul.msk.f32.vlgmr.msra.gmra.mxu0 %vm337_vm8, %v328_v56 }
 0x14a   : > { %v358_v58 = vpop.f32.mrf.mxu0 }
 0x14b   : > { %v361_v59 = vmax.f32 %v358_v58, 0.0 }
 0x14d   : > { %595 = vmatmul.msk.f32.vlgmr.msra.gmra.mxu1 %vm363_vm10, %v361_v59 }
 0x1ca   : > { %v388_v63 = vpop.f32.mrf.mxu1 }
 0x1cb   : > { %v392_v3 = vrot.slane %v388_v63, 1 }
 0x1cd   : > { %v394_v5 = vadd.f32 %v392_v3, %v388_v63 }
 0x1cf   : > { %v596_v6 = vmul.f32 -1.442695, %v394_v5 }
 0x1d1   : > { %663 = vpow2.f32 %v596_v6 }
 0x1d7   : > { %v664_v11 = vpop.eup %663 }
 0x1d8   : > { %v398_v12 = vadd.f32 1.0, %v664_v11 }
 0x1da   : > { %665 = vrcp.f32 %v398_v12  ;;  %v410_v20 = vand.u32 2147483648, %v398_v12  ;;  %v408_v49 = vand.u32 2147483647, %v398_v12  ;;  %vm404_vm12 = vweird.f32 %v398_v12 }
 0x1dc   : > { %v411_v25 = vor.u32 1.1754944e-38, %v410_v20  ;;  %vm409_vm14 = vcmp.eq.f32.partialorder %v408_v49, 8.507059e+37 }
 0x1e0   : > { %v666_v13 = vpop.eup %665 }
 0x1e1   : > { %v400_v18 = vmul.f32 %v666_v13, %v398_v12  ;;  %vm405_vm11 = vweird.f32 %v666_v13 }
 0x1e2   : > { %vm406_vm13 = vmor %vm404_vm12, %vm405_vm11 }
 0x1e3   : > { %v401_v19 = vsub.f32 1.0, %v400_v18 }
 0x1e5   : > { %v402_v23 = vmul.f32 %v666_v13, %v401_v19 }
 0x1e7   : > { %v403_v24 = vadd.f32 %v666_v13, %v402_v23 }
 0x1e9   : > { %v407_v28 = vsel %vm406_vm13, %v666_v13, %v403_v24 }
 0x1ea   : > { %v412_v29 = vsel %vm409_vm14, %v411_v25, %v407_v28 }
 0x1eb   : > { %v414_v30 = vperm.slane %v412_v29, 0 }
 0x1ed   : > { %431 = vperm.xlu0 %656, %v414_v30   ;;  %425 = vperm.xlu2 %655, %v414_v30  }
 0x1ee   : > { %419 = vperm.xlu1 %654, %v414_v30  }
 0x1f5   : > { %657 = vset.pattern.permute.xlu2 %v435_v31  ;;  %662 = vset.pattern.permute.xlu0 %v459_v33 }
 0x1f6   : > { %658 = vset.pattern.permute.xlu1 %v441_v32 }
 0x1fd   : > { %437 = vperm.xlu2 %657, %v414_v30  }
 0x1fe   : > { %443 = vperm.xlu1 %658, %v414_v30  }
 0x205   : > { %659 = vset.pattern.permute.xlu2 %v447_v34 }
 0x206   : > { %660 = vset.pattern.permute.xlu1 %v453_v35 }
 0x20d   : > { %449 = vperm.xlu2 %659, %v414_v30  }
 0x20e   : > { %455 = vperm.xlu1 %660, %v414_v30  }
 0x215   : > { %661 = vset.pattern.permute.xlu2 %v459_v33 }
 0x21d   : > { %461 = vperm.xlu2 %661, %v414_v30  }
 0x247   : > { %v426_v36 = vpop.permute.xlu2 %425 }
 0x248   : > { %v465_v37 = vmul.f32 %v426_v36, %v912_v9  ;;  %v466_v38 = vmul.f32 %v426_v36, %v915_v10 }
 0x24a   : > { %481 = vst [vmem:[%s1008_s7 + $0x10] sm:$0xff] %v465_v37 }
 0x24b   : > { %482 = vst [vmem:[%s1008_s7 + $0x18] sm:$0xff] %v466_v38 }
 0x257   : > { %v438_v39 = vpop.permute.xlu2 %437 }
 0x258   : > { %v469_v40 = vmul.f32 %v438_v39, %v906_v7  ;;  %v470_v9 = vmul.f32 %v438_v39, %v909_v8 }
 0x25a   : > { %485 = vst [vmem:[%s1008_s7 + $0x30] sm:$0xff] %v469_v40 }
 0x25b   : > { %486 = vst [vmem:[%s1008_s7 + $0x38] sm:$0xff] %v470_v9 }
 0x25f   : > { %v432_v10 = vpop.permute.xlu0 %431 }
 0x260   : > { %v467_v41 = vmul.f32 %v432_v10, %v888_v0  ;;  %v468_v42 = vmul.f32 %v432_v10, %v891_v1  ;;  %v420_v43 = vpop.permute.xlu1 %419 }
 0x261   : > { %v463_v44 = vmul.f32 %v420_v43, %v894_v2  ;;  %v464_v45 = vmul.f32 %v420_v43, %v899_v4 }
 0x262   : > { %483 = vst [vmem:[%s1008_s7 + $0x20] sm:$0xff] %v467_v41 }
 0x263   : > { %484 = vst [vmem:[%s1008_s7 + $0x28] sm:$0xff] %v468_v42 }
 0x264   : > { %479 = vst [vmem:[%s1008_s7] sm:$0xff] %v463_v44 }
 0x265   : > { %480 = vst [vmem:[%s1008_s7 + $0x8] sm:$0xff] %v464_v45 }
 0x267   : > { %v450_v7 = vpop.permute.xlu2 %449 }
 0x268   : > { %v473_v8 = vmul.f32 %v450_v7, %v930_v16  ;;  %v474_v0 = vmul.f32 %v450_v7, %v933_v17 }
 0x26a   : > { %489 = vst [vmem:[%s1008_s7 + $0x50] sm:$0xff] %v473_v8 }
 0x26b   : > { %490 = vst [vmem:[%s1008_s7 + $0x58] sm:$0xff] %v474_v0 }
 0x270   : > { %v444_v1 = vpop.permute.xlu1 %443 }
 0x271   : > { %v471_v2 = vmul.f32 %v444_v1, %v924_v14  ;;  %v472_v4 = vmul.f32 %v444_v1, %v927_v15 }
 0x273   : > { %487 = vst [vmem:[%s1008_s7 + $0x40] sm:$0xff] %v471_v2 }
 0x274   : > { %488 = vst [vmem:[%s1008_s7 + $0x48] sm:$0xff] %v472_v4 }
 0x277   : > { %v462_v46 = vpop.permute.xlu2 %461 }
 0x278   : > { %v477_v47 = vmul.f32 %v462_v46, %v954_v26  ;;  %v478_v16 = vmul.f32 %v462_v46, %v957_v27 }
 0x27a   : > { %493 = vst [vmem:[%s1008_s7 + $0x70] sm:$0xff] %v477_v47 }
 0x27b   : > { %494 = vst [vmem:[%s1008_s7 + $0x78] sm:$0xff] %v478_v16 }
 0x280   : > { %v456_v14 = vpop.permute.xlu1 %455 }
 0x281   : > { %v475_v15 = vmul.f32 %v456_v14, %v942_v21  ;;  %v476_v17 = vmul.f32 %v456_v14, %v945_v22 }
 0x283   : > { %491 = vst [vmem:[%s1008_s7 + $0x60] sm:$0xff] %v475_v15 }
 0x284   : > { %492 = vst [vmem:[%s1008_s7 + $0x68] sm:$0xff] %v476_v17 }
 0x285   : > { %724 = shalt.err (!%p721_p4)
}
 0x286   : > { %s767_s29 = smov 256   ;;  %s768_s6 = smov 16  }
 0x287   : > { %606 = dma.vmem_to_hbm [thread:$0]  (%p839_p11), %s509_s11, 2048, %s511_s17, %s496_s19, %s767_s29, %s767_s29, %s768_s6  }
 0x288 PF: > { %s525_s23 = sand.u32 1, %s751_s12   ;;  %p1083_p7 = scmp.ge.s32.totalorder %s763_s15, 2 }
 0x289   : > { %s526_s5 = scalar_lea.sflag [#allocation4], %s525_s23 }
 0x28a   : > { %p613_p5 = pnand %p1083_p7, %p843_p12 }
 0x28c   : > { %p614_p8 = pneg %p613_p5 }
 0x28e   : > { %746 = dma.done.wait (%p614_p8), %s526_s5, 2048  }
 0x28f   : > { %748 = vsyncadd (%p614_p8), %s526_s5, 4294965248  ;;  %p16_p10 = scmp.ge.s32.totalorder %s814_s18, 4   ;;  %s1084_s12 = smov %s755_s13 }
 0x290   : > { %s1085_s13 = smov %s759_s14  ;;  %s1086_s14 = smov %s826_s21 }
 0x291   : > { %s1087_s15 = smov %s814_s18  ;;  %18 = sbr.rel (!%p16_p10) target bundleno = 5 (0x5), region = 77 }
 0x296   :  { %532 = vsyncpa [#allocation3], 1 }
 0x297   :  { %534 = vsyncpa [#allocation3 + $0x1], 1 }
 0x298   :  { %535 = vsyncpa [#allocation4], 1 }
 0x299   :  { %537 = vsyncpa [#allocation4 + $0x1], 1 }

</bundles_post_ra>
